<compile_context>
chip_gen: v7x
topology: tpu7x:2x2x1
jax: 0.10.0
libtpu: 0.0.40
codegen_flags: <defaults>
</compile_context>

<pallas_src>
import functools

import jax
import jax.numpy as jnp
from jax.experimental import pallas as pl
from jax.experimental.pallas import tpu as pltpu


def _round_up(x: int, m: int) -> int:
    return ((x + m - 1) // m) * m


def _encoder_kernel(x_ref, w1_ref, b1_ref, w2_ref, b2_ref, out_ref,
                    *, matmul_dtype):
    # x_ref  : (TB, 12)  f32  pitch-class histogram tile (ragged last block OK:
    #                         rows are independent; OOB tail rows are dropped
    #                         by the clipped output writeback).
    # w1_ref : (12, E)   f32  Linear(12, E) weight (x @ W layout), resident.
    # b1_ref : (1, E)    f32  Linear(12, E) bias, resident.
    # w2_ref : (E, E)    f32  Linear(E, E) weight, resident.
    # b2_ref : (1, E)    f32  Linear(E, E) bias, resident.
    # out_ref: (TB, E)   f32  encoding tile.
    x = x_ref[...]
    w1 = w1_ref[...]
    w2 = w2_ref[...]
    if matmul_dtype != jnp.float32:
        # v6e/v7x option: bf16 MXU operands, f32 accumulation.
        x = x.astype(matmul_dtype)
        w1 = w1.astype(matmul_dtype)
        w2 = w2.astype(matmul_dtype)

    # First Linear + Tanh (accumulate in f32; bias add / tanh in f32).
    h = jnp.tanh(
        jnp.dot(x, w1, preferred_element_type=jnp.float32) + b1_ref[...]
    )

    # Dropout: identity in eval mode (forward-pass inference).

    if matmul_dtype != jnp.float32:
        h = h.astype(matmul_dtype)

    # Second Linear; store the unpadded (TB, E) tile.
    out_ref[...] = (
        jnp.dot(h, w2, preferred_element_type=jnp.float32) + b2_ref[...]
    )


def pitch_class_histogram_encoder_forward(pitch_histogram, w1, b1, w2, b2,
                                          *, max_block_batch=2048,
                                          use_bf16_matmul=False):
    """Pallas implementation of PitchClassHistogramEncoder.forward (eval mode).

    Args:
      pitch_histogram: (batch, 12) f32 pitch-class histograms.
      w1: (12, E) f32, b1: (E,) f32   -- first Linear (already in x @ W layout).
      w2: (E, E) f32,  b2: (E,) f32   -- second Linear.
      max_block_batch: cap on the batch tile (VMEM safety / sweep knob).
      use_bf16_matmul: cast MXU operands to bf16 (f32 accumulation). Leave
        False on v5e or when bit-faithful f32 matmul is required.
    Returns:
      (batch, E) f32 encoding.
    """
    batch, in_dim = pitch_histogram.shape
    e = w1.shape[1]
    assert w2.shape == (e, e) and b1.shape == (e,) and b2.shape == (e,)

    f32 = jnp.float32
    x = pitch_histogram.astype(f32)
    w1 = w1.astype(f32)
    w2 = w2.astype(f32)
    b1_2d = b1.astype(f32).reshape(1, e)
    b2_2d = b2.astype(f32).reshape(1, e)

    # Batch tile: aim for >= 2 grid steps (v7x has 2 TensorCores and the batch
    # axis is marked "parallel"), but make each step as big as possible to
    # amortize the ~0.35 us fixed per-step pipeline overhead. Sublane-align to 8.
    tb = _round_up(pl.cdiv(batch, 2), 8)
    tb = max(8, min(tb, max_block_batch))
    grid = (pl.cdiv(batch, tb),)   # ragged last block handled by Pallas.

    matmul_dtype = jnp.bfloat16 if use_bf16_matmul else jnp.float32
    kernel = functools.partial(_encoder_kernel, matmul_dtype=matmul_dtype)

    cost = pl.CostEstimate(
        flops=2 * batch * (in_dim * e + e * e),
        transcendentals=batch * e,
        bytes_accessed=4 * (batch * in_dim + batch * e
                            + in_dim * e + e + e * e + e),
    )

    return pl.pallas_call(
        kernel,
        out_shape=jax.ShapeDtypeStruct((batch, e), f32),
        grid=grid,
        in_specs=[
            pl.BlockSpec((tb, in_dim), lambda i: (i, 0)),   # x: tiled over batch
            pl.BlockSpec((in_dim, e), lambda i: (0, 0)),    # W1: resident
            pl.BlockSpec((1, e), lambda i: (0, 0)),         # b1: resident
            pl.BlockSpec((e, e), lambda i: (0, 0)),         # W2: resident
            pl.BlockSpec((1, e), lambda i: (0, 0)),         # b2: resident
        ],
        out_specs=pl.BlockSpec((tb, e), lambda i: (i, 0)),  # unpadded (tb, E) store
        compiler_params=pltpu.CompilerParams(
            dimension_semantics=("parallel",),
        ),
        cost_estimate=cost,
    )(x, w1, b1_2d, w2, b2_2d)


def _reference(pitch_histogram, w1, b1, w2, b2):
    # Pure-JAX reference (dropout is identity in eval mode).
    h = jnp.tanh(pitch_histogram @ w1 + b1)
    return h @ w2 + b2


if __name__ == "__main__":
    key = jax.random.PRNGKey(0)
    k_x, k_w1, k_b1, k_w2, k_b2, k_x2 = jax.random.split(key, 6)

    encoding_size = 32  # config.histogram_encoding_size
    in_dim = 12         # pitch classes

    # Deterministic example parameters.
    w1 = 0.1 * jax.random.normal(k_w1, (in_dim, encoding_size), dtype=jnp.float32)
    b1 = 0.1 * jax.random.normal(k_b1, (encoding_size,), dtype=jnp.float32)
    w2 = 0.1 * jax.random.normal(k_w2, (encoding_size, encoding_size),
                                 dtype=jnp.float32)
    b2 = 0.1 * jax.random.normal(k_b2, (encoding_size,), dtype=jnp.float32)

    # Case 1: small batch -> single grid step.
    batch = 8
    x = jax.random.uniform(k_x, (batch, in_dim), dtype=jnp.float32)
    x = x / jnp.sum(x, axis=1, keepdims=True)
    out = jax.block_until_ready(
        pitch_class_histogram_encoder_forward(x, w1, b1, w2, b2))
    ref = _reference(x, w1, b1, w2, b2)
    assert out.shape == (batch, encoding_size)
    assert jnp.allclose(out, ref, atol=1e-5), "mismatch vs reference (batch=8)"

    # Case 2: batch not divisible by the tile -> multi-step grid with a ragged
    # last block (exercises the unpadded-input / clipped-output path).
    batch2 = 20
    x2 = jax.random.uniform(k_x2, (batch2, in_dim), dtype=jnp.float32)
    x2 = x2 / jnp.sum(x2, axis=1, keepdims=True)
    out2 = jax.block_until_ready(
        pitch_class_histogram_encoder_forward(x2, w1, b1, w2, b2))
    ref2 = _reference(x2, w1, b1, w2, b2)
    assert out2.shape == (batch2, encoding_size)
    assert jnp.allclose(out2, ref2, atol=1e-5), "mismatch vs reference (batch=20)"

    print("KERNEL_OK")
</pallas_src>

<mosaic_0001>
module attributes {stable_mosaic.version = 11 : i64} {
  func.func @_encoder_kernel(%arg0: i32, %arg1: memref<8x12xf32, #tpu.memory_space<vmem>>, %arg2: memref<12x32xf32, #tpu.memory_space<vmem>>, %arg3: memref<1x32xf32, #tpu.memory_space<vmem>>, %arg4: memref<32x32xf32, #tpu.memory_space<vmem>>, %arg5: memref<1x32xf32, #tpu.memory_space<vmem>>, %arg6: memref<8x32xf32, #tpu.memory_space<vmem>>) attributes {dimension_semantics = [#tpu.dimension_semantics<parallel>], iteration_bounds = array<i64: 1>, scalar_prefetch = 0 : i64, scratch_operands = 0 : i64, tpu.core_type = #tpu.core_type<tc>, window_params = [{transform_indices = @transform_0, window_bounds = array<i64: 8, 12>}, {pipeline_mode = #tpu.pipeline_mode<synchronous>, transform_indices = @transform_1, window_bounds = array<i64: 12, 32>}, {pipeline_mode = #tpu.pipeline_mode<synchronous>, transform_indices = @transform_2, window_bounds = array<i64: 1, 32>}, {pipeline_mode = #tpu.pipeline_mode<synchronous>, transform_indices = @transform_3, window_bounds = array<i64: 32, 32>}, {pipeline_mode = #tpu.pipeline_mode<synchronous>, transform_indices = @transform_4, window_bounds = array<i64: 1, 32>}, {transform_indices = @transform_5, window_bounds = array<i64: 8, 32>}]} {
    %c0 = arith.constant 0 : index
    %c0_0 = arith.constant 0 : index
    %0 = vector.load %arg1[%c0, %c0_0] : memref<8x12xf32, #tpu.memory_space<vmem>>, vector<8x12xf32>
    %c0_1 = arith.constant 0 : index
    %c0_2 = arith.constant 0 : index
    %1 = vector.load %arg2[%c0_1, %c0_2] : memref<12x32xf32, #tpu.memory_space<vmem>>, vector<12x32xf32>
    %c0_3 = arith.constant 0 : index
    %c0_4 = arith.constant 0 : index
    %2 = vector.load %arg4[%c0_3, %c0_4] : memref<32x32xf32, #tpu.memory_space<vmem>>, vector<32x32xf32>
    %cst = arith.constant dense<0.000000e+00> : vector<8x32xf32>
    %3 = tpu.matmul %0, %1, %cst {dimension_numbers = #tpu.dot_dimension_numbers<[1], [0], [0], [1], [0, 0, 1, 1], [], []>} : vector<8x12xf32>, vector<12x32xf32>, vector<8x32xf32> -> vector<8x32xf32>
    %c0_5 = arith.constant 0 : index
    %c0_6 = arith.constant 0 : index
    %4 = vector.load %arg3[%c0_5, %c0_6] : memref<1x32xf32, #tpu.memory_space<vmem>>, vector<1x32xf32>
    %5 = vector.broadcast %4 : vector<1x32xf32> to vector<8x32xf32>
    %6 = arith.addf %3, %5 : vector<8x32xf32>
    %7 = math.tanh %6 : vector<8x32xf32>
    %cst_7 = arith.constant dense<0.000000e+00> : vector<8x32xf32>
    %8 = tpu.matmul %7, %2, %cst_7 {dimension_numbers = #tpu.dot_dimension_numbers<[1], [0], [0], [1], [0, 0, 1, 1], [], []>} : vector<8x32xf32>, vector<32x32xf32>, vector<8x32xf32> -> vector<8x32xf32>
    %c0_8 = arith.constant 0 : index
    %c0_9 = arith.constant 0 : index
    %9 = vector.load %arg5[%c0_8, %c0_9] : memref<1x32xf32, #tpu.memory_space<vmem>>, vector<1x32xf32>
    %10 = vector.broadcast %9 : vector<1x32xf32> to vector<8x32xf32>
    %11 = arith.addf %8, %10 : vector<8x32xf32>
    %c0_10 = arith.constant 0 : index
    %c0_11 = arith.constant 0 : index
    %12 = vector.load %arg6[%c0_10, %c0_11] : memref<8x32xf32, #tpu.memory_space<vmem>>, vector<8x32xf32>
    tpu.vector_store %arg6[%c0_10, %c0_11], %11 {strides = array<i32>} : memref<8x32xf32, #tpu.memory_space<vmem>>, vector<8x32xf32>,
    return
  }
  func.func @transform_0(%arg0: i32) -> (i32, i32) {
    %c0_i32 = arith.constant 0 : i32
    %c0_i32_0 = arith.constant 0 : i32
    return %arg0, %c0_i32 : i32, i32
  }
  func.func @transform_1(%arg0: i32) -> (i32, i32) {
    %c0_i32 = arith.constant 0 : i32
    %c0_i32_0 = arith.constant 0 : i32
    %c0_i32_1 = arith.constant 0 : i32
    return %c0_i32, %c0_i32_0 : i32, i32
  }
  func.func @transform_2(%arg0: i32) -> (i32, i32) {
    %c0_i32 = arith.constant 0 : i32
    %c0_i32_0 = arith.constant 0 : i32
    %c0_i32_1 = arith.constant 0 : i32
    return %c0_i32, %c0_i32_0 : i32, i32
  }
  func.func @transform_3(%arg0: i32) -> (i32, i32) {
    %c0_i32 = arith.constant 0 : i32
    %c0_i32_0 = arith.constant 0 : i32
    %c0_i32_1 = arith.constant 0 : i32
    return %c0_i32, %c0_i32_0 : i32, i32
  }
  func.func @transform_4(%arg0: i32) -> (i32, i32) {
    %c0_i32 = arith.constant 0 : i32
    %c0_i32_0 = arith.constant 0 : i32
    %c0_i32_1 = arith.constant 0 : i32
    return %c0_i32, %c0_i32_0 : i32, i32
  }
  func.func @transform_5(%arg0: i32) -> (i32, i32) {
    %c0_i32 = arith.constant 0 : i32
    %c0_i32_0 = arith.constant 0 : i32
    return %arg0, %c0_i32 : i32, i32
  }
}

</mosaic_0001>

<bundles_post_ra>
// kernel: tpu_custom_call.1
= control target key start
LH: loop header
LB: loop body
LE: loop exit
PB: predicated region body
PF: predicated region fallthrough
CT: control target
= control target key end

     0   :  { %10 = vsyncpa [#allocation3], 0  ;;  %s498_s0 = inlined_call_operand.hbm [shape: f32[8,12], index: 0, kind: input, shape index: {}]   ;;  %s499_s1 = inlined_call_operand.hbm [shape: f32[12,32], index: 1, kind: input, shape index: {}]   ;;  %s500_s2 = inlined_call_operand.vmem [shape: f32[1,32], index: 2, kind: input, shape index: {}]   ;;  %s501_s3 = inlined_call_operand.hbm [shape: f32[32,32], index: 3, kind: input, shape index: {}]   ;;  %s502_s4 = inlined_call_operand.vmem [shape: f32[1,32], index: 4, kind: input, shape index: {}]   ;;  %s503_s5 = inlined_call_operand.hbm [shape: f32[8,32], index: 5, kind: output, shape index: {}]  }
   0x1   :  { %11 = vsyncpa [#allocation6], 0 }
   0x2   :  { %12 = vsyncpa [#allocation4], 0  ;;  %s398_s18 = smov [#allocation5]   ;;  %s304_s22 = scalar_lea.hbm %s499_s1, 256 }
   0x3   :  { %s28_s19 = sshll.u32 %s398_s18, 4  ;;  %p305_p0 = scmp.ne.s32.totalorder %s499_s1, %s304_s22  ;;  %s29_s19 = int_to_ptr.vmem [resolvable:$true] %s28_s19 }
   0x4   :  { %p308_p1 = scmp.lt.u32.totalorder %s304_s22, %s499_s1 }
   0x6   :  { %p310_p2 = pnand %p308_p1, %p305_p0 }
   0x8   :  { %313 = shalt.err (!%p310_p2)
}
   0x9   :  { %s314_s27 = scalar_lea.vmem %s29_s19, 256  ;;  %p319_p4 = scmp.lt.s32.totalorder %s29_s19, %s29_s19 }
   0xa   :  { %p315_p3 = scmp.ne.s32.totalorder %s29_s19, %s314_s27  ;;  %p320_p5 = scmp.lt.s32.totalorder %s314_s27, %s314_s27 }
   0xc   :  { %p321_p6 = por %p320_p5, %p319_p4 }
   0xe   :  { %p322_p7 = pnand %p321_p6, %p315_p3 }
  0x10   :  { %325 = shalt.err (!%p322_p7)
}
  0x11   :  { %s399_s28 = smov 128   ;;  %s400_s29 = smov 8  }
  0x12   :  { %34 = dma.hbm_to_vmem [thread:$0]  %s499_s1, 256, %s29_s19, [#allocation6], %s399_s28, %s399_s28, %s400_s29  }
  0x13   :  { %s401_s7 = smov [#allocation2]   ;;  %s402_s9 = smov [#allocation7]  }
  0x14   :  { %s19_s8 = sshll.u32 %s401_s7, 4  ;;  %s42_s10 = sshll.u32 %s402_s9, 4  ;;  %s20_s8 = int_to_ptr.vmem [resolvable:$true] %s19_s8  ;;  %s43_s10 = int_to_ptr.vmem [resolvable:$true] %s42_s10 }
  0x15   :  { %s326_s13 = scalar_lea.hbm %s498_s0, 128 }
  0x16   :  { %p327_p8 = scmp.ne.s32.totalorder %s498_s0, %s326_s13  ;;  %p330_p9 = scmp.lt.u32.totalorder %s326_s13, %s498_s0 }
  0x18   :  { %p332_p10 = pnand %p330_p9, %p327_p8 }
  0x1a   :  { %335 = shalt.err (!%p332_p10)
}
  0x1b   :  { %s336_s1 = scalar_lea.vmem %s20_s8, 128  ;;  %p341_p12 = scmp.lt.s32.totalorder %s20_s8, %s20_s8 }
  0x1c   :  { %p337_p11 = scmp.ne.s32.totalorder %s20_s8, %s336_s1  ;;  %p342_p13 = scmp.lt.s32.totalorder %s336_s1, %s336_s1 }
  0x1e   :  { %p343_p0 = por %p342_p13, %p341_p12 }
  0x20   :  { %p344_p1 = pnand %p343_p0, %p337_p11 }
  0x22   :  { %347 = shalt.err (!%p344_p1)
}
  0x23   :  { %22 = dma.hbm_to_vmem [thread:$0]  %s498_s0, 128, %s20_s8, [#allocation3]  }
  0x24   :  { %s348_s22 = scalar_lea.hbm %s501_s3, 512 }
  0x25   :  { %p349_p2 = scmp.ne.s32.totalorder %s501_s3, %s348_s22  ;;  %p352_p3 = scmp.lt.u32.totalorder %s348_s22, %s501_s3 }
  0x27   :  { %p354_p4 = pnand %p352_p3, %p349_p2 }
  0x29   :  { %357 = shalt.err (!%p354_p4)
}
  0x2a   :  { %s358_s27 = scalar_lea.vmem %s43_s10, 512  ;;  %p363_p6 = scmp.lt.s32.totalorder %s43_s10, %s43_s10 }
  0x2b   :  { %p359_p5 = scmp.ne.s32.totalorder %s43_s10, %s358_s27  ;;  %p364_p7 = scmp.lt.s32.totalorder %s358_s27, %s358_s27 }
  0x2d   :  { %p365_p8 = por %p364_p7, %p363_p6 }
  0x2f   :  { %p366_p9 = pnand %p365_p8, %p359_p5 }
  0x31   :  { %369 = shalt.err (!%p366_p9)
}
  0x32   :  { %48 = dma.hbm_to_vmem [thread:$0]  %s501_s3, 512, %s43_s10, [#allocation6], %s399_s28, %s399_s28, %s400_s29  }
  0x33   :  { %392 = dma.done.wait [#allocation3], 128  }
  0x34   :  { %393 = vsyncadd [#allocation3], 4294967168 }
  0x35   :  { %394 = dma.done.wait [#allocation6], 768  }
  0x36   :  { %395 = vsyncadd [#allocation6], 4294966528  ;;  %v403_v0 = vmov 0.0|0.0   ;;  %vm404_vm0 = vmmov 0   ;;  %v405_v1 = vmov 0.0   ;;  %vm78_vm1 = vcmask 1043456  }
  0x37   :  { %282 = vmatprep.subr.bf16.mxu0 %v403_v0  ;;  %286 = vmatprep.subr.bf16.mxu1 %v403_v0  ;;  %v61_v2 = vld [vmem:[#allocation5] sm:$0xff]  ;;  %v62_v3 = vld [vmem:[#allocation5 + $0x8] sm:$0xf]  ;;  %vm406_vm2 = vmmov 1   ;;  %v60_v5 = vld [vmem:[#allocation2] sm:$0xff]  ;;  %vm74_vm4 = vcmask 97280  }
  0x38   :  { %268 = vmatprep.mubr.msk.f32.mxu0 %vm404_vm0, %v405_v1  ;;  %279 = vmatprep.mubr.msk.f32.mxu1 %vm404_vm0, %v405_v1  ;;  %vm284_vm3 = vmpackc.low %vm78_vm1, %vm406_vm2  ;;  %v283_v4 = vpack.c.bf16 %v62_v3, %v61_v2  ;;  %v63_v6 = vld [vmem:[#allocation7] sm:$0xff]  ;;  %v64_v7 = vld [vmem:[#allocation7 + $0x8] sm:$0xff]  ;;  %vm160_vm5 = vcmask 261120   ;;  %s407_s7 = smov [#allocation8]  }
  0x39   :  { %v65_v8 = vld [vmem:[#allocation7 + $0x10] sm:$0xff]  ;;  %v287_v9 = vpack.c.bf16 %v64_v7, %v63_v6  ;;  %v66_v10 = vld [vmem:[#allocation7 + $0x18] sm:$0xff]  ;;  %v251_v12 = vld [vmem:[%s500_s2] ss:$0 sm:$0xff]  ;;  %s241_s8 = sshll.u32 %s407_s7, 4  ;;  %s242_s8 = int_to_ptr.vmem [resolvable:$true] %s241_s8 }
  0x3a   :  { %285 = vmatpush3.bf16.msk.msra.mxu0 %vm284_vm3, %v283_v4  ;;  %v290_v11 = vpack.c.bf16 %v66_v10, %v65_v8  ;;  %v254_v17 = vld [vmem:[%s502_s4] ss:$0 sm:$0xff]  ;;  %s370_s9 = scalar_lea.vmem %s242_s8, 128  ;;  %p375_p11 = scmp.lt.s32.totalorder %s242_s8, %s242_s8 }
  0x3b   :  { %288 = vmatpush3.bf16.msra.mxu1 %v287_v9  ;;  %p371_p10 = scmp.ne.s32.totalorder %s242_s8, %s370_s9  ;;  %p376_p12 = scmp.lt.s32.totalorder %s370_s9, %s370_s9 }
  0x3c   :  { %289 = vmatprep.subr.bf16.mxu1 %v403_v0 }
  0x3d   :  { %269 = vmatmul.mubr.msk.f32.vlgmr.msra.gmra.mrb[0].mxu0 %vm74_vm4, %v60_v5  ;;  %p377_p13 = por %p376_p12, %p375_p11 }
  0x3f   :  { %291 = vmatpush3.bf16.msra.mxu1 %v290_v11  ;;  %p378_p0 = pnand %p377_p13, %p371_p10 }
 0x110   :  { %v148_v13 = vpop.f32.mrb[0].mxu0 }
 0x111   :  { %v149_v14 = vadd.f32 %v251_v12, %v148_v13  ;;  %v270_v15 = vpop.f32.mrb[1].mxu0 }
 0x113   :  { %302 = vtanh.f32 %v149_v14 }
 0x11d   :  { %v303_v16 = vpop.eup %302 }
 0x11e   :  { %280 = vmatmul.mubr.msk.f32.vlgmr.msra.gmra.mrb[0].mxu1 %vm160_vm5, %v303_v16 }
 0x1f1   :  { %v230_v18 = vpop.f32.mrb[0].mxu1 }
 0x1f2   :  { %v231_v19 = vadd.f32 %v254_v17, %v230_v18  ;;  %v281_v20 = vpop.f32.mrb[1].mxu1 }
 0x1f4   :  { %234 = vst.msk [vmem:[#allocation8] sm:$0xff] %vm160_vm5, %v231_v19 }
 0x1f5   :  { %381 = shalt.err (!%p378_p0)
}
 0x1f6   :  { %s382_s11 = scalar_lea.hbm %s503_s5, 128 }
 0x1f7   :  { %p383_p1 = scmp.ne.s32.totalorder %s503_s5, %s382_s11  ;;  %p386_p2 = scmp.lt.u32.totalorder %s382_s11, %s503_s5 }
 0x1f9   :  { %p388_p3 = pnand %p386_p2, %p383_p1 }
 0x1fb   :  { %391 = shalt.err (!%p388_p3)
}
 0x1fc   :  { %244 = dma.vmem_to_hbm [thread:$0]  %s242_s8, 128, %s503_s5, [#allocation4]  }
 0x1fd   :  { %396 = dma.done.wait [#allocation4], 128  }
 0x1fe   :  { %397 = vsyncadd [#allocation4], 4294967168 }
 0x1ff   :  { %248 = vsyncpa [#allocation3], 1 }
 0x200   :  { %249 = vsyncpa [#allocation6], 1 }
 0x201   :  { %250 = vsyncpa [#allocation4], 1 }

</bundles_post_ra>
